<compile_context>
chip_gen: v6e
topology: v6e:2x2x1
jax: 0.10.0
libtpu: 0.0.40
codegen_flags: <defaults>
</compile_context>

<pallas_src>
import math
import functools

import jax
import jax.numpy as jnp
from jax import lax
from jax.experimental import pallas as pl
from jax.experimental.pallas import tpu as pltpu


_MASK_VALUE = -1e30  # finite "minus infinity": online softmax never sees NaN


# --------------------------------------------------------------------------
# Hardware detection: generation-dependent VMEM budget / bf16 EUP availability
# --------------------------------------------------------------------------
def _device_kind() -> str:
    try:
        return jax.devices()[0].device_kind.lower()
    except Exception:
        return ""


def _vmem_limit_bytes():
    # Prefer the trace-time query; fall back to device_kind string matching.
    try:
        cap = int(pltpu.get_tpu_info().vmem_capacity_bytes)
        # Leave ~25% headroom for compiler-internal scratch; never ask for >96 MiB.
        return min(cap * 3 // 4, 96 * 1024 * 1024)
    except Exception:
        pass
    kind = _device_kind()
    if "v7" in kind or "7x" in kind:          # 64 MiB per TensorCore
        return 48 * 1024 * 1024
    if "v5" in kind or "v6" in kind:          # 128 MiB (scoped default is only 16-32)
        return 96 * 1024 * 1024
    return None                               # unknown chip: keep compiler default


_VMEM_LIMIT = _vmem_limit_bytes()
# v6e/v7x EUP has a bf16 path (~2x f32 exp throughput); v5e does not.
_KIND = _device_kind()
_BF16_EUP = ("v6" in _KIND) or ("v7" in _KIND) or ("7x" in _KIND)


def _compiler_params():
    return pltpu.CompilerParams(
        dimension_semantics=("parallel", "parallel", "parallel", "arbitrary"),
        vmem_limit_bytes=_VMEM_LIMIT,
    )


# --------------------------------------------------------------------------
# Tiling helpers
# --------------------------------------------------------------------------
def _pick_tile(n, cap, align):
    """Largest multiple of `align` that divides n and is <= cap; full dim if n <= cap."""
    if n <= cap:
        return n
    t = (cap // align) * align
    while t >= align:
        if n % t == 0:
            return t
        t -= align
    # No aligned divisor <= cap: refuse to silently blow VMEM with a huge tile.
    if n > 4 * cap:
        raise ValueError(
            f"dimension {n} has no tile that is a multiple of {align} and <= {cap}; "
            "pad the input to a friendlier size")
    # TODO(synk): remainder-tile support instead of falling back to the full dim.
    return n


def _head_block(num_heads, head_dim, cap_lanes=1024):
    """Largest divisor of num_heads with hb*head_dim ~<= cap_lanes (>= 1)."""
    cap = max(1, cap_lanes // max(head_dim, 1))
    hb = 1
    for d in range(1, num_heads + 1):
        if num_heads % d == 0 and d <= cap:
            hb = d
    return hb


# --------------------------------------------------------------------------
# Fused Q/K/V projection kernel
#   x [B, S, H] @ w_qkv [Hh, H, D]  ->  qkv [B, Hh, S, D]   (Hh = Hq + 2*Hkv)
# Grid: (B, head_blocks, S_tiles, K_tiles); hidden (K) reduction innermost.
# --------------------------------------------------------------------------
def _qkv_proj_kernel(x_ref, w_ref, o_ref, acc_ref, *, hb):
    ki = pl.program_id(3)

    @pl.when(ki == 0)
    def _():
        acc_ref[...] = jnp.zeros_like(acc_ref)

    x = x_ref[0]                       # [ts, tk], input dtype straight into the MXU
    for j in range(hb):                # static unroll over packed heads (x tile shared)
        acc_ref[j] += jnp.dot(x, w_ref[j], preferred_element_type=jnp.float32)

    @pl.when(ki == pl.num_programs(3) - 1)
    def _():
        o_ref[0] = acc_ref[...].astype(o_ref.dtype)


def fused_qkv_projection(x, w_qkv):
    B, S, H = x.shape
    Hh, H2, D = w_qkv.shape
    assert H == H2
    ts = _pick_tile(S, 512, 8)
    tk = _pick_tile(H, 1024, 128)
    hb = _head_block(Hh, D, cap_lanes=1024)

    kernel = functools.partial(_qkv_proj_kernel, hb=hb)
    return pl.pallas_call(
        kernel,
        out_shape=jax.ShapeDtypeStruct((B, Hh, S, D), x.dtype),
        grid_spec=pltpu.PrefetchScalarGridSpec(
            num_scalar_prefetch=0,
            grid=(B, Hh // hb, S // ts, H // tk),
            in_specs=[
                pl.BlockSpec((1, ts, tk), lambda b, h, si, ki: (b, si, ki)),
                pl.BlockSpec((hb, tk, D), lambda b, h, si, ki: (h, ki, 0)),
            ],
            out_specs=pl.BlockSpec((1, hb, ts, D), lambda b, h, si, ki: (b, h, si, 0)),
            scratch_shapes=[pltpu.VMEM((hb, ts, D), jnp.float32)],
        ),
        compiler_params=_compiler_params(),
    )(x, w_qkv)


# --------------------------------------------------------------------------
# Flash-style GQA attention kernel
#   qkv [B, Hh, S, D] -> attn [B, Hq, S, D]
# Grid: (B, Hkv, Q_tiles, KV_tiles), KV reduction innermost ("arbitrary").
# All `group` query heads of a KV group are handled per step, so the K/V tile
# is fetched once per group and reused.
# --------------------------------------------------------------------------
def _flash_gqa_kernel(*refs, group, causal, has_mask, tq, tkv, bf16_exp):
    if has_mask:
        q_ref, k_ref, v_ref, mask_ref, o_ref, m_sc, l_sc, acc_sc = refs
    else:
        q_ref, k_ref, v_ref, o_ref, m_sc, l_sc, acc_sc = refs

    qi = pl.program_id(2)
    ki = pl.program_id(3)

    @pl.when(ki == 0)
    def _():
        m_sc[...] = jnp.full_like(m_sc, -jnp.inf)
        l_sc[...] = jnp.zeros_like(l_sc)
        acc_sc[...] = jnp.zeros_like(acc_sc)

    def compute():
        k = k_ref[...]                           # [tkv, D], input dtype (no upcast)
        v = v_ref[...]                           # [tkv, D]
        if has_mask:
            add_mask = mask_ref[...].astype(jnp.float32)     # [tq, tkv] additive (bf16 in HBM)
        if causal:
            row = lax.broadcasted_iota(jnp.int32, (tq, tkv), 0) + qi * tq
            col = lax.broadcasted_iota(jnp.int32, (tq, tkv), 1) + ki * tkv
            keep = row >= col

        def one_head(j):
            q = q_ref[j]                         # [tq, D]; 1/sqrt(D) already folded into Wq
            s = lax.dot_general(q, k, (((1,), (1,)), ((), ())),
                                preferred_element_type=jnp.float32)
            if has_mask:
                s = s + add_mask
            if causal:
                s = jnp.where(keep, s, _MASK_VALUE)
            m_prev = m_sc[j]
            m_new = jnp.maximum(m_prev, jnp.max(s, axis=-1, keepdims=True))
            alpha = jnp.exp(m_prev - m_new)
            x = s - m_new
            if bf16_exp:                         # v6e/v7x EUP bf16 path (model in bf16)
                p = jnp.exp(x.astype(jnp.bfloat16))
            else:
                p = jnp.exp(x)
            l_sc[j] = alpha * l_sc[j] + jnp.sum(p.astype(jnp.float32),
                                                axis=-1, keepdims=True)
            acc_sc[j] = alpha * acc_sc[j] + jnp.dot(
                p.astype(v.dtype), v, preferred_element_type=jnp.float32)
            m_sc[j] = m_new

        if group >= 8:
            # Bounded unroll caps vreg pressure (full static unroll spills at group>=8).
            def body(j, carry):
                one_head(j)
                return carry
            lax.fori_loop(0, group, body, 0, unroll=2)
        else:
            for j in range(group):               # static unroll for small groups
                one_head(j)

    if causal:
        # Skip KV tiles that lie entirely above the diagonal of this Q tile.
        @pl.when(ki * tkv <= qi * tq + (tq - 1))
        def _():
            compute()
    else:
        compute()

    @pl.when(ki == pl.num_programs(3) - 1)
    def _():
        # Exact reciprocal (division) once per tile; approx reciprocal costs accuracy.
        o_ref[...] = (acc_sc[...] / l_sc[...]).astype(o_ref.dtype)


def _canonicalize_mask(attention_mask, B, S):
    m = jnp.asarray(attention_mask)
    if m.ndim == 2:
        m = m[None]
    elif m.ndim == 4:
        if m.shape[1] != 1:
            raise ValueError("per-query-head attention masks are not supported; "
                             f"expected [B, 1, S, S], got {m.shape}")
        m = m[:, 0]
    elif m.ndim != 3:
        raise ValueError(f"unsupported attention mask rank: {m.shape}")
    if m.shape[-2:] != (S, S):
        raise ValueError(f"attention mask last dims must be ({S},{S}), got {m.shape}")
    if m.shape[0] not in (1, B):
        raise ValueError(f"attention mask batch dim must be 1 or {B}, got {m.shape[0]}")
    # Clamp -inf to a large finite value (no NaN in the online softmax) and stream the
    # mask as bf16 (half the HBM bytes); -1e9 still underflows exp() to exactly 0.
    m = jnp.maximum(m.astype(jnp.float32), -1e9)
    return m.astype(jnp.bfloat16)


def flash_gqa_attention(qkv, attention_mask, *, num_heads, num_kv_heads, is_causal=False):
    B, Hh, S, D = qkv.shape
    Hq, Hkv = num_heads, num_kv_heads
    assert Hh == Hq + 2 * Hkv
    group = Hq // Hkv

    tq = _pick_tile(S, 512, 8)
    tkv = _pick_tile(S, 1024, 128)

    has_mask = attention_mask is not None
    causal = bool(is_causal) and not has_mask
    bf16_exp = _BF16_EUP and qkv.dtype == jnp.bfloat16

    q_map = lambda b, g, qi, ki: (b, g, qi, 0)             # heads [g*group, (g+1)*group)

    if causal:
        def kv_block(qi, ki):
            # Clamp so fully-masked (skipped) KV tiles map to the already-fetched block:
            # Pallas elides the DMA when the block index does not change.
            return jnp.minimum(ki, (qi * tq + (tq - 1)) // tkv)
    else:
        def kv_block(qi, ki):
            return ki
    k_map = lambda b, g, qi, ki: (b, Hq + g, kv_block(qi, ki), 0)        # KV head g (K)
    v_map = lambda b, g, qi, ki: (b, Hq + Hkv + g, kv_block(qi, ki), 0)  # KV head g (V)

    in_specs = [
        pl.BlockSpec((None, group, tq, D), q_map),
        pl.BlockSpec((None, None, tkv, D), k_map),
        pl.BlockSpec((None, None, tkv, D), v_map),
    ]
    operands = [qkv, qkv, qkv]

    if has_mask:
        mask = _canonicalize_mask(attention_mask, B, S)
        if mask.shape[0] == 1:
            mask_map = lambda b, g, qi, ki: (0, qi, ki)
        else:
            mask_map = lambda b, g, qi, ki: (b, qi, ki)
        in_specs.append(pl.BlockSpec((None, tq, tkv), mask_map))
        operands.append(mask)

    kernel = functools.partial(
        _flash_gqa_kernel, group=group, causal=causal, has_mask=has_mask,
        tq=tq, tkv=tkv, bf16_exp=bf16_exp)

    return pl.pallas_call(
        kernel,
        out_shape=jax.ShapeDtypeStruct((B, Hq, S, D), qkv.dtype),
        grid_spec=pltpu.PrefetchScalarGridSpec(
            num_scalar_prefetch=0,
            grid=(B, Hkv, S // tq, S // tkv),
            in_specs=in_specs,
            out_specs=pl.BlockSpec((None, group, tq, D), q_map),
            scratch_shapes=[
                pltpu.VMEM((group, tq, 1), jnp.float32),   # running max m
                pltpu.VMEM((group, tq, 1), jnp.float32),   # running sum l
                pltpu.VMEM((group, tq, D), jnp.float32),   # f32 output accumulator
            ],
        ),
        compiler_params=_compiler_params(),
    )(*operands)


# --------------------------------------------------------------------------
# Output projection kernel
#   attn [B, Hq, S, D] @ w_o [Hq, D, H] -> out [B, S, H]
# Grid: (B, S_tiles, N_tiles, head_blocks); head reduction innermost.
# Consumes the per-head attention layout directly (no merge-heads transpose).
# --------------------------------------------------------------------------
def _o_proj_kernel(a_ref, w_ref, o_ref, acc_ref, *, hb):
    hi = pl.program_id(3)

    @pl.when(hi == 0)
    def _():
        acc_ref[...] = jnp.zeros_like(acc_ref)

    for j in range(hb):  # static unroll over packed heads
        acc_ref[...] += jnp.dot(a_ref[0, j], w_ref[j],
                                preferred_element_type=jnp.float32)

    @pl.when(hi == pl.num_programs(3) - 1)
    def _():
        o_ref[0] = acc_ref[...].astype(o_ref.dtype)


def output_projection(attn, w_o):
    B, Hq, S, D = attn.shape
    Hq2, D2, H = w_o.shape
    assert Hq == Hq2 and D == D2
    ts = _pick_tile(S, 512, 8)
    tn = _pick_tile(H, 1024, 128)
    hb = _head_block(Hq, D, cap_lanes=1024)

    kernel = functools.partial(_o_proj_kernel, hb=hb)
    return pl.pallas_call(
        kernel,
        out_shape=jax.ShapeDtypeStruct((B, S, H), attn.dtype),
        grid_spec=pltpu.PrefetchScalarGridSpec(
            num_scalar_prefetch=0,
            grid=(B, S // ts, H // tn, Hq // hb),
            in_specs=[
                pl.BlockSpec((1, hb, ts, D), lambda b, si, nj, h: (b, h, si, 0)),
                pl.BlockSpec((hb, D, tn), lambda b, si, nj, h: (h, 0, nj)),
            ],
            out_specs=pl.BlockSpec((1, ts, tn), lambda b, si, nj, h: (b, si, nj)),
            scratch_shapes=[pltpu.VMEM((ts, tn), jnp.float32)],
        ),
        compiler_params=_compiler_params(),
    )(attn, w_o)


# --------------------------------------------------------------------------
# Module wrapper with deterministic parameter init
# --------------------------------------------------------------------------
class GroupedQueryAttentionPallas:
    def __init__(self, hidden_size, num_heads, num_kv_heads, key):
        assert hidden_size % num_heads == 0
        assert num_heads % num_kv_heads == 0
        self.hidden_size = hidden_size
        self.num_heads = num_heads
        self.num_kv_heads = num_kv_heads
        self.head_dim = hidden_size // num_heads
        self.scale = 1.0 / math.sqrt(self.head_dim)

        k_qkv, k_o = jax.random.split(key)
        std = 0.02
        Hh = num_heads + 2 * num_kv_heads
        # Per-head weight layout lets the kernels produce/consume the
        # [B, heads, S, D] layout directly (no XLA transposes around pallas_call).
        w_qkv = std * jax.random.normal(
            k_qkv, (Hh, hidden_size, self.head_dim), jnp.float32)      # [Hq+2Hkv, H, D]
        # Fold 1/sqrt(head_dim) into the Q weights so the attention kernel never
        # multiplies the [tq, tkv] score tile by a scalar.
        self.w_qkv = w_qkv.at[:num_heads].multiply(self.scale)
        self.w_o = std * jax.random.normal(
            k_o, (num_heads, self.head_dim, hidden_size), jnp.float32)  # [Hq, D, H]

    def __call__(self, hidden_states, attention_mask=None, *, is_causal=False):
        qkv = fused_qkv_projection(hidden_states, self.w_qkv)           # [B, Hq+2Hkv, S, D]
        attn = flash_gqa_attention(qkv, attention_mask,
                                   num_heads=self.num_heads,
                                   num_kv_heads=self.num_kv_heads,
                                   is_causal=is_causal)                 # [B, Hq, S, D]
        return output_projection(attn, self.w_o)                        # [B, S, H]


# --------------------------------------------------------------------------
# Pure-JAX reference for correctness sanity check
# (the 1/sqrt(D) scale is already folded into module.w_qkv[:Hq])
# --------------------------------------------------------------------------
def _reference(module, hidden_states, attention_mask):
    Hq, Hkv = module.num_heads, module.num_kv_heads
    wq = module.w_qkv[:Hq]
    wk = module.w_qkv[Hq:Hq + Hkv]
    wv = module.w_qkv[Hq + Hkv:]
    q = jnp.einsum("bsh,nhd->bnsd", hidden_states, wq)
    k = jnp.einsum("bsh,nhd->bnsd", hidden_states, wk)
    v = jnp.einsum("bsh,nhd->bnsd", hidden_states, wv)
    rep = Hq // Hkv
    k = jnp.repeat(k, rep, axis=1)
    v = jnp.repeat(v, rep, axis=1)
    scores = jnp.einsum("bnqd,bnkd->bnqk", q, k)
    if attention_mask is not None:
        scores = scores + attention_mask
    p = jax.nn.softmax(scores, axis=-1)
    attn = jnp.einsum("bnqk,bnkd->bnqd", p, v)
    return jnp.einsum("bnsd,ndh->bsh", attn, module.w_o)


def _rel_err(a, b):
    return float(jnp.max(jnp.abs(a - b)) / (jnp.max(jnp.abs(b)) + 1e-12))


if __name__ == "__main__":
    key = jax.random.PRNGKey(0)
    k_x, k_params = jax.random.split(key)

    B, S, H = 2, 8, 32
    num_heads, num_kv_heads = 4, 2

    hidden_states = jax.random.normal(k_x, (B, S, H), jnp.float32)

    # causal additive attention mask, [B, 1, S, S]
    causal = jnp.tril(jnp.ones((S, S), dtype=bool))
    attention_mask = jnp.where(causal, 0.0, -1e9).astype(jnp.float32)
    attention_mask = jnp.broadcast_to(attention_mask[None, None], (B, 1, S, S))

    module = GroupedQueryAttentionPallas(H, num_heads, num_kv_heads, k_params)

    tol = 2e-3

    # 1) explicit additive mask path (bf16 mask stream)
    out_mask = jax.block_until_ready(module(hidden_states, attention_mask))
    ref_mask = _reference(module, hidden_states, attention_mask)
    err1 = _rel_err(out_mask, ref_mask)
    if not err1 < tol:
        raise AssertionError(f"masked path mismatch vs JAX reference (rel_err={err1})")

    # 2) in-kernel causal path (no mask stream, block skipping)
    out_causal = jax.block_until_ready(module(hidden_states, None, is_causal=True))
    err2 = _rel_err(out_causal, ref_mask)
    if not err2 < tol:
        raise AssertionError(f"in-kernel causal path mismatch (rel_err={err2})")

    # 3) mask-free path
    out_none = jax.block_until_ready(module(hidden_states, None))
    ref_none = _reference(module, hidden_states, None)
    err3 = _rel_err(out_none, ref_none)
    if not err3 < tol:
        raise AssertionError(f"mask-free path mismatch (rel_err={err3})")

    print("KERNEL_OK")
</pallas_src>

<mosaic_0001>
module attributes {stable_mosaic.version = 11 : i64} {
  func.func @_qkv_proj_kernel(%arg0: i32, %arg1: i32, %arg2: i32, %arg3: i32, %arg4: memref<1x8x32xf32, #tpu.memory_space<vmem>>, %arg5: memref<8x32x8xf32, #tpu.memory_space<vmem>>, %arg6: memref<1x8x8x8xf32, #tpu.memory_space<vmem>>, %arg7: memref<8x8x8xf32, #tpu.memory_space<vmem>>) attributes {dimension_semantics = [#tpu.dimension_semantics<parallel>, #tpu.dimension_semantics<parallel>, #tpu.dimension_semantics<parallel>, #tpu.dimension_semantics<arbitrary>], iteration_bounds = array<i64: 2, 1, 1, 1>, scalar_prefetch = 0 : i64, scratch_operands = 1 : i64, tpu.core_type = #tpu.core_type<tc>, window_params = [{transform_indices = @transform_0, window_bounds = array<i64: 1, 8, 32>}, {transform_indices = @transform_1, window_bounds = array<i64: 8, 32, 8>}, {transform_indices = @transform_2, window_bounds = array<i64: 1, 8, 8, 8>}]} {
    %c0_i32 = arith.constant 0 : i32
    %0 = arith.cmpi eq, %arg3, %c0_i32 : i32
    %1 = arith.extui %0 : i1 to i32
    %c0_i32_0 = arith.constant 0 : i32
    %2 = arith.cmpi ne, %1, %c0_i32_0 : i32
    scf.if %2 {
      %cst_77 = arith.constant 0.000000e+00 : f32
      %80 = vector.broadcast %cst_77 : f32 to vector<8x8x8xf32>
      %c0_78 = arith.constant 0 : index
      %c0_79 = arith.constant 0 : index
      %c0_80 = arith.constant 0 : index
      %81 = vector.load %arg7[%c0_78, %c0_79, %c0_80] : memref<8x8x8xf32, #tpu.memory_space<vmem>>, vector<8x8x8xf32>
      tpu.vector_store %arg7[%c0_78, %c0_79, %c0_80], %80 {strides = array<i32>} : memref<8x8x8xf32, #tpu.memory_space<vmem>>, vector<8x8x8xf32>,
    } else {
    }
    %c0 = arith.constant 0 : index
    %c0_1 = arith.constant 0 : index
    %c0_2 = arith.constant 0 : index
    %3 = vector.load %arg4[%c0, %c0_1, %c0_2] : memref<1x8x32xf32, #tpu.memory_space<vmem>>, vector<1x8x32xf32>
    %4 = vector.shape_cast %3 : vector<1x8x32xf32> to vector<8x32xf32>
    %c0_3 = arith.constant 0 : index
    %c0_4 = arith.constant 0 : index
    %c0_5 = arith.constant 0 : index
    %5 = vector.load %arg7[%c0_3, %c0_4, %c0_5] : memref<8x8x8xf32, #tpu.memory_space<vmem>>, vector<1x8x8xf32>
    %6 = vector.shape_cast %5 : vector<1x8x8xf32> to vector<8x8xf32>
    %c0_6 = arith.constant 0 : index
    %c0_7 = arith.constant 0 : index
    %c0_8 = arith.constant 0 : index
    %7 = vector.load %arg5[%c0_6, %c0_7, %c0_8] : memref<8x32x8xf32, #tpu.memory_space<vmem>>, vector<1x32x8xf32>
    %8 = vector.shape_cast %7 : vector<1x32x8xf32> to vector<32x8xf32>
    %cst = arith.constant dense<0.000000e+00> : vector<8x8xf32>
    %9 = tpu.matmul %4, %8, %cst {dimension_numbers = #tpu.dot_dimension_numbers<[1], [0], [0], [1], [0, 0, 1, 1], [], []>} : vector<8x32xf32>, vector<32x8xf32>, vector<8x8xf32> -> vector<8x8xf32>
    %10 = arith.addf %6, %9 : vector<8x8xf32>
    %c0_9 = arith.constant 0 : index
    %c0_10 = arith.constant 0 : index
    %c0_11 = arith.constant 0 : index
    %11 = vector.load %arg7[%c0_9, %c0_10, %c0_11] : memref<8x8x8xf32, #tpu.memory_space<vmem>>, vector<1x8x8xf32>
    %12 = vector.shape_cast %11 : vector<1x8x8xf32> to vector<8x8xf32>
    %13 = vector.shape_cast %10 : vector<8x8xf32> to vector<1x8x8xf32>
    tpu.vector_store %arg7[%c0_9, %c0_10, %c0_11], %13 {strides = array<i32>} : memref<8x8x8xf32, #tpu.memory_space<vmem>>, vector<1x8x8xf32>,
    %c1 = arith.constant 1 : index
    %c0_12 = arith.constant 0 : index
    %c0_13 = arith.constant 0 : index
    %14 = vector.load %arg7[%c1, %c0_12, %c0_13] : memref<8x8x8xf32, #tpu.memory_space<vmem>>, vector<1x8x8xf32>
    %15 = vector.shape_cast %14 : vector<1x8x8xf32> to vector<8x8xf32>
    %c1_14 = arith.constant 1 : index
    %c0_15 = arith.constant 0 : index
    %c0_16 = arith.constant 0 : index
    %16 = vector.load %arg5[%c1_14, %c0_15, %c0_16] : memref<8x32x8xf32, #tpu.memory_space<vmem>>, vector<1x32x8xf32>
    %17 = vector.shape_cast %16 : vector<1x32x8xf32> to vector<32x8xf32>
    %cst_17 = arith.constant dense<0.000000e+00> : vector<8x8xf32>
    %18 = tpu.matmul %4, %17, %cst_17 {dimension_numbers = #tpu.dot_dimension_numbers<[1], [0], [0], [1], [0, 0, 1, 1], [], []>} : vector<8x32xf32>, vector<32x8xf32>, vector<8x8xf32> -> vector<8x8xf32>
    %19 = arith.addf %15, %18 : vector<8x8xf32>
    %c1_18 = arith.constant 1 : index
    %c0_19 = arith.constant 0 : index
    %c0_20 = arith.constant 0 : index
    %20 = vector.load %arg7[%c1_18, %c0_19, %c0_20] : memref<8x8x8xf32, #tpu.memory_space<vmem>>, vector<1x8x8xf32>
    %21 = vector.shape_cast %20 : vector<1x8x8xf32> to vector<8x8xf32>
    %22 = vector.shape_cast %19 : vector<8x8xf32> to vector<1x8x8xf32>
    tpu.vector_store %arg7[%c1_18, %c0_19, %c0_20], %22 {strides = array<i32>} : memref<8x8x8xf32, #tpu.memory_space<vmem>>, vector<1x8x8xf32>,
    %c2 = arith.constant 2 : index
    %c0_21 = arith.constant 0 : index
    %c0_22 = arith.constant 0 : index
    %23 = vector.load %arg7[%c2, %c0_21, %c0_22] : memref<8x8x8xf32, #tpu.memory_space<vmem>>, vector<1x8x8xf32>
    %24 = vector.shape_cast %23 : vector<1x8x8xf32> to vector<8x8xf32>
    %c2_23 = arith.constant 2 : index
    %c0_24 = arith.constant 0 : index
    %c0_25 = arith.constant 0 : index
    %25 = vector.load %arg5[%c2_23, %c0_24, %c0_25] : memref<8x32x8xf32, #tpu.memory_space<vmem>>, vector<1x32x8xf32>
    %26 = vector.shape_cast %25 : vector<1x32x8xf32> to vector<32x8xf32>
    %cst_26 = arith.constant dense<0.000000e+00> : vector<8x8xf32>
    %27 = tpu.matmul %4, %26, %cst_26 {dimension_numbers = #tpu.dot_dimension_numbers<[1], [0], [0], [1], [0, 0, 1, 1], [], []>} : vector<8x32xf32>, vector<32x8xf32>, vector<8x8xf32> -> vector<8x8xf32>
    %28 = arith.addf %24, %27 : vector<8x8xf32>
    %c2_27 = arith.constant 2 : index
    %c0_28 = arith.constant 0 : index
    %c0_29 = arith.constant 0 : index
    %29 = vector.load %arg7[%c2_27, %c0_28, %c0_29] : memref<8x8x8xf32, #tpu.memory_space<vmem>>, vector<1x8x8xf32>
    %30 = vector.shape_cast %29 : vector<1x8x8xf32> to vector<8x8xf32>
    %31 = vector.shape_cast %28 : vector<8x8xf32> to vector<1x8x8xf32>
    tpu.vector_store %arg7[%c2_27, %c0_28, %c0_29], %31 {strides = array<i32>} : memref<8x8x8xf32, #tpu.memory_space<vmem>>, vector<1x8x8xf32>,
    %c3 = arith.constant 3 : index
    %c0_30 = arith.constant 0 : index
    %c0_31 = arith.constant 0 : index
    %32 = vector.load %arg7[%c3, %c0_30, %c0_31] : memref<8x8x8xf32, #tpu.memory_space<vmem>>, vector<1x8x8xf32>
    %33 = vector.shape_cast %32 : vector<1x8x8xf32> to vector<8x8xf32>
    %c3_32 = arith.constant 3 : index
    %c0_33 = arith.constant 0 : index
    %c0_34 = arith.constant 0 : index
    %34 = vector.load %arg5[%c3_32, %c0_33, %c0_34] : memref<8x32x8xf32, #tpu.memory_space<vmem>>, vector<1x32x8xf32>
    %35 = vector.shape_cast %34 : vector<1x32x8xf32> to vector<32x8xf32>
    %cst_35 = arith.constant dense<0.000000e+00> : vector<8x8xf32>
    %36 = tpu.matmul %4, %35, %cst_35 {dimension_numbers = #tpu.dot_dimension_numbers<[1], [0], [0], [1], [0, 0, 1, 1], [], []>} : vector<8x32xf32>, vector<32x8xf32>, vector<8x8xf32> -> vector<8x8xf32>
    %37 = arith.addf %33, %36 : vector<8x8xf32>
    %c3_36 = arith.constant 3 : index
    %c0_37 = arith.constant 0 : index
    %c0_38 = arith.constant 0 : index
    %38 = vector.load %arg7[%c3_36, %c0_37, %c0_38] : memref<8x8x8xf32, #tpu.memory_space<vmem>>, vector<1x8x8xf32>
    %39 = vector.shape_cast %38 : vector<1x8x8xf32> to vector<8x8xf32>
    %40 = vector.shape_cast %37 : vector<8x8xf32> to vector<1x8x8xf32>
    tpu.vector_store %arg7[%c3_36, %c0_37, %c0_38], %40 {strides = array<i32>} : memref<8x8x8xf32, #tpu.memory_space<vmem>>, vector<1x8x8xf32>,
    %c4 = arith.constant 4 : index
    %c0_39 = arith.constant 0 : index
    %c0_40 = arith.constant 0 : index
    %41 = vector.load %arg7[%c4, %c0_39, %c0_40] : memref<8x8x8xf32, #tpu.memory_space<vmem>>, vector<1x8x8xf32>
    %42 = vector.shape_cast %41 : vector<1x8x8xf32> to vector<8x8xf32>
    %c4_41 = arith.constant 4 : index
    %c0_42 = arith.constant 0 : index
    %c0_43 = arith.constant 0 : index
    %43 = vector.load %arg5[%c4_41, %c0_42, %c0_43] : memref<8x32x8xf32, #tpu.memory_space<vmem>>, vector<1x32x8xf32>
    %44 = vector.shape_cast %43 : vector<1x32x8xf32> to vector<32x8xf32>
    %cst_44 = arith.constant dense<0.000000e+00> : vector<8x8xf32>
    %45 = tpu.matmul %4, %44, %cst_44 {dimension_numbers = #tpu.dot_dimension_numbers<[1], [0], [0], [1], [0, 0, 1, 1], [], []>} : vector<8x32xf32>, vector<32x8xf32>, vector<8x8xf32> -> vector<8x8xf32>
    %46 = arith.addf %42, %45 : vector<8x8xf32>
    %c4_45 = arith.constant 4 : index
    %c0_46 = arith.constant 0 : index
    %c0_47 = arith.constant 0 : index
    %47 = vector.load %arg7[%c4_45, %c0_46, %c0_47] : memref<8x8x8xf32, #tpu.memory_space<vmem>>, vector<1x8x8xf32>
    %48 = vector.shape_cast %47 : vector<1x8x8xf32> to vector<8x8xf32>
    %49 = vector.shape_cast %46 : vector<8x8xf32> to vector<1x8x8xf32>
    tpu.vector_store %arg7[%c4_45, %c0_46, %c0_47], %49 {strides = array<i32>} : memref<8x8x8xf32, #tpu.memory_space<vmem>>, vector<1x8x8xf32>,
    %c5 = arith.constant 5 : index
    %c0_48 = arith.constant 0 : index
    %c0_49 = arith.constant 0 : index
    %50 = vector.load %arg7[%c5, %c0_48, %c0_49] : memref<8x8x8xf32, #tpu.memory_space<vmem>>, vector<1x8x8xf32>
    %51 = vector.shape_cast %50 : vector<1x8x8xf32> to vector<8x8xf32>
    %c5_50 = arith.constant 5 : index
    %c0_51 = arith.constant 0 : index
    %c0_52 = arith.constant 0 : index
    %52 = vector.load %arg5[%c5_50, %c0_51, %c0_52] : memref<8x32x8xf32, #tpu.memory_space<vmem>>, vector<1x32x8xf32>
    %53 = vector.shape_cast %52 : vector<1x32x8xf32> to vector<32x8xf32>
    %cst_53 = arith.constant dense<0.000000e+00> : vector<8x8xf32>
    %54 = tpu.matmul %4, %53, %cst_53 {dimension_numbers = #tpu.dot_dimension_numbers<[1], [0], [0], [1], [0, 0, 1, 1], [], []>} : vector<8x32xf32>, vector<32x8xf32>, vector<8x8xf32> -> vector<8x8xf32>
    %55 = arith.addf %51, %54 : vector<8x8xf32>
    %c5_54 = arith.constant 5 : index
    %c0_55 = arith.constant 0 : index
    %c0_56 = arith.constant 0 : index
    %56 = vector.load %arg7[%c5_54, %c0_55, %c0_56] : memref<8x8x8xf32, #tpu.memory_space<vmem>>, vector<1x8x8xf32>
    %57 = vector.shape_cast %56 : vector<1x8x8xf32> to vector<8x8xf32>
    %58 = vector.shape_cast %55 : vector<8x8xf32> to vector<1x8x8xf32>
    tpu.vector_store %arg7[%c5_54, %c0_55, %c0_56], %58 {strides = array<i32>} : memref<8x8x8xf32, #tpu.memory_space<vmem>>, vector<1x8x8xf32>,
    %c6 = arith.constant 6 : index
    %c0_57 = arith.constant 0 : index
    %c0_58 = arith.constant 0 : index
    %59 = vector.load %arg7[%c6, %c0_57, %c0_58] : memref<8x8x8xf32, #tpu.memory_space<vmem>>, vector<1x8x8xf32>
    %60 = vector.shape_cast %59 : vector<1x8x8xf32> to vector<8x8xf32>
    %c6_59 = arith.constant 6 : index
    %c0_60 = arith.constant 0 : index
    %c0_61 = arith.constant 0 : index
    %61 = vector.load %arg5[%c6_59, %c0_60, %c0_61] : memref<8x32x8xf32, #tpu.memory_space<vmem>>, vector<1x32x8xf32>
    %62 = vector.shape_cast %61 : vector<1x32x8xf32> to vector<32x8xf32>
    %cst_62 = arith.constant dense<0.000000e+00> : vector<8x8xf32>
    %63 = tpu.matmul %4, %62, %cst_62 {dimension_numbers = #tpu.dot_dimension_numbers<[1], [0], [0], [1], [0, 0, 1, 1], [], []>} : vector<8x32xf32>, vector<32x8xf32>, vector<8x8xf32> -> vector<8x8xf32>
    %64 = arith.addf %60, %63 : vector<8x8xf32>
    %c6_63 = arith.constant 6 : index
    %c0_64 = arith.constant 0 : index
    %c0_65 = arith.constant 0 : index
    %65 = vector.load %arg7[%c6_63, %c0_64, %c0_65] : memref<8x8x8xf32, #tpu.memory_space<vmem>>, vector<1x8x8xf32>
    %66 = vector.shape_cast %65 : vector<1x8x8xf32> to vector<8x8xf32>
    %67 = vector.shape_cast %64 : vector<8x8xf32> to vector<1x8x8xf32>
    tpu.vector_store %arg7[%c6_63, %c0_64, %c0_65], %67 {strides = array<i32>} : memref<8x8x8xf32, #tpu.memory_space<vmem>>, vector<1x8x8xf32>,
    %c7 = arith.constant 7 : index
    %c0_66 = arith.constant 0 : index
    %c0_67 = arith.constant 0 : index
    %68 = vector.load %arg7[%c7, %c0_66, %c0_67] : memref<8x8x8xf32, #tpu.memory_space<vmem>>, vector<1x8x8xf32>
    %69 = vector.shape_cast %68 : vector<1x8x8xf32> to vector<8x8xf32>
    %c7_68 = arith.constant 7 : index
    %c0_69 = arith.constant 0 : index
    %c0_70 = arith.constant 0 : index
    %70 = vector.load %arg5[%c7_68, %c0_69, %c0_70] : memref<8x32x8xf32, #tpu.memory_space<vmem>>, vector<1x32x8xf32>
    %71 = vector.shape_cast %70 : vector<1x32x8xf32> to vector<32x8xf32>
    %cst_71 = arith.constant dense<0.000000e+00> : vector<8x8xf32>
    %72 = tpu.matmul %4, %71, %cst_71 {dimension_numbers = #tpu.dot_dimension_numbers<[1], [0], [0], [1], [0, 0, 1, 1], [], []>} : vector<8x32xf32>, vector<32x8xf32>, vector<8x8xf32> -> vector<8x8xf32>
    %73 = arith.addf %69, %72 : vector<8x8xf32>
    %c7_72 = arith.constant 7 : index
    %c0_73 = arith.constant 0 : index
    %c0_74 = arith.constant 0 : index
    %74 = vector.load %arg7[%c7_72, %c0_73, %c0_74] : memref<8x8x8xf32, #tpu.memory_space<vmem>>, vector<1x8x8xf32>
    %75 = vector.shape_cast %74 : vector<1x8x8xf32> to vector<8x8xf32>
    %76 = vector.shape_cast %73 : vector<8x8xf32> to vector<1x8x8xf32>
    tpu.vector_store %arg7[%c7_72, %c0_73, %c0_74], %76 {strides = array<i32>} : memref<8x8x8xf32, #tpu.memory_space<vmem>>, vector<1x8x8xf32>,
    %c0_i32_75 = arith.constant 0 : i32
    %77 = arith.cmpi eq, %arg3, %c0_i32_75 : i32
    %78 = arith.extui %77 : i1 to i32
    %c0_i32_76 = arith.constant 0 : i32
    %79 = arith.cmpi ne, %78, %c0_i32_76 : i32
    scf.if %79 {
      %c0_77 = arith.constant 0 : index
      %c0_78 = arith.constant 0 : index
      %c0_79 = arith.constant 0 : index
      %80 = vector.load %arg7[%c0_77, %c0_78, %c0_79] : memref<8x8x8xf32, #tpu.memory_space<vmem>>, vector<8x8x8xf32>
      %c0_80 = arith.constant 0 : index
      %c0_81 = arith.constant 0 : index
      %c0_82 = arith.constant 0 : index
      %c0_83 = arith.constant 0 : index
      %81 = vector.load %arg6[%c0_80, %c0_81, %c0_82, %c0_83] : memref<1x8x8x8xf32, #tpu.memory_space<vmem>>, vector<1x8x8x8xf32>
      %82 = vector.shape_cast %81 : vector<1x8x8x8xf32> to vector<8x8x8xf32>
      %83 = vector.shape_cast %80 : vector<8x8x8xf32> to vector<1x8x8x8xf32>
      tpu.vector_store %arg6[%c0_80, %c0_81, %c0_82, %c0_83], %83 {strides = array<i32>} : memref<1x8x8x8xf32, #tpu.memory_space<vmem>>, vector<1x8x8x8xf32>,
    } else {
    }
    return
  }
  func.func @transform_0(%arg0: i32, %arg1: i32, %arg2: i32, %arg3: i32) -> (i32, i32, i32) {
    %c0_i32 = arith.constant 0 : i32
    return %arg0, %arg2, %arg3 : i32, i32, i32
  }
  func.func @transform_1(%arg0: i32, %arg1: i32, %arg2: i32, %arg3: i32) -> (i32, i32, i32) {
    %c0_i32 = arith.constant 0 : i32
    %c0_i32_0 = arith.constant 0 : i32
    return %arg1, %arg3, %c0_i32 : i32, i32, i32
  }
  func.func @transform_2(%arg0: i32, %arg1: i32, %arg2: i32, %arg3: i32) -> (i32, i32, i32, i32) {
    %c0_i32 = arith.constant 0 : i32
    %c0_i32_0 = arith.constant 0 : i32
    return %arg0, %arg1, %arg2, %c0_i32 : i32, i32, i32, i32
  }
}

</mosaic_0001>

<bundles_post_ra>
// kernel: tpu_custom_call.1
= control target key start
LH: loop header
LB: loop body
LE: loop exit
PB: predicated region body
PF: predicated region fallthrough
CT: control target
= control target key end

     0   :  { %7 = vsyncpa [#allocation4], 0  ;;  %s1683_s0 = inlined_call_operand.vmem [shape: f32[2,8,32], index: 0, kind: input, shape index: {}]   ;;  %s1684_s1 = inlined_call_operand.vmem [shape: f32[8,32,8], index: 1, kind: input, shape index: {}]   ;;  %s1685_s2 = inlined_call_operand.hbm [shape: f32[2,8,8,8], index: 2, kind: output, shape index: {}]  }
   0x1   :  { %9 = vsyncpa [#allocation4 + $0x1], 0  ;;  %s1360_s9 = smov 0   ;;  %s1362_s10 = smov 0  }
   0x2   :  { %s1364_s11 = smov 0   ;;  %s1366_s12 = smov 0  }
   0x3   :  { %s1368_s13 = smov 0   ;;  %s1370_s14 = smov 0  }
   0x4 LB: > { %s1025_s15 = sadd.s32 4294967295, %s1338_s14   ;;  %s1026_s16 = sadd.s32 4294967294, %s1338_s14   ;;  %s1338_s14 = sphi %s1370_s14, %s15_s14   ;;  %s1334_s13 = sphi %s1368_s13, %s1692_s13   ;;  %s1330_s12 = sphi %s1366_s12, %s1691_s12   ;;  %s1326_s11 = sphi %s1364_s11, %s1690_s11   ;;  %s1322_s10 = sphi %s1362_s10, %s1689_s10   ;;  %s1318_s9 = sphi %s1360_s9, %s1688_s9  }
   0x5   : > { %s41_s17 = sadd.s32 1, %s1334_s13  ;;  %s110_s18 = sadd.s32 1, %s1326_s11 }
   0x6   : > { %p43_p0 = scmp.ge.s32.totalorder %s41_s17, 2  ;;  %p120_p1 = scmp.ne.s32.totalorder %s1326_s11, %s1322_s10 }
   0x7   : > { %p121_p2 = scmp.eq.s32.totalorder %s1025_s15, 1  ;;  %p126_p3 = scmp.ne.s32.totalorder %s1322_s10, %s1318_s9 }
   0x8   : > { %s1694_s17 = smov (%p43_p0, %s41_s17), 0  ;;  %p127_p5 = scmp.eq.s32.totalorder %s1026_s16, 1 }
   0x9   : > { %p1400_p4 = por %p121_p2, %p120_p1  ;;  %s103_s20 = ssub.s32 %s1334_s13, %s1694_s17 }
   0xa   : > { %p1030_p6 = scmp.ge.s32.totalorder %s1338_s14, 1  ;;  %p108_p7 = scmp.eq.s32.totalorder %s103_s20, 0 }
   0xb   : > { %p1407_p8 = por %p127_p5, %p126_p3  ;;  %p173_p9 = scmp.lt.s32.totalorder %s1338_s14, 3 }
   0xc   : > { %s1413_s22 = scalar_select %p108_p7, %s1326_s11, %s110_s18  }
   0xd   : > { %p174_p10 = pnand %p1030_p6, %p173_p9 }
   0xe   : > { %p210_p11 = scmp.lt.s32.totalorder (!%p174_p10), %s1330_s12, 1  ;;  %s207_s16 = sand.u32 (!%p174_p10), 1, %s1322_s10  }
   0xf   : > { %177 = sbr.rel (%p174_p10) target bundleno = 277 (0x115), region = 28  ;;  %s1031_s18 = sshll.u32 (!%p174_p10), %s207_s16, 6 }
  0x10   : > { %s1603_s20 = scalar_lea.vmem (!%p174_p10), [#allocation3], %s1031_s18  ;;  %s1638_s28 = scalar_lea.sflag (!%p174_p10), [#allocation4], %s207_s16 }
  0x11   : > { %s918_s24 = sshll.u32 (!%p174_p10), %s1603_s20, 4  ;;  %s1342_s29 = smov (!%p174_p10), [#allocation3]   ;;  %s1630_s24 = int_to_ptr.vmem [resolvable:$true] %s918_s24 }
  0x12   : > { %s1266_s30 = sshll.u32 (!%p174_p10), %s1342_s29, 4  ;;  %s1267_s30 = int_to_ptr.vmem [resolvable:$false] %s1266_s30 }
  0x13   : > { %p1269_p1 = scmp.lt.s32.totalorder (!%p174_p10), %s1630_s24, %s1267_s30 }
  0x14   : > { %v251_v0 = vld [vmem:[%s1684_s1 + $0x18] sm:$0xff]  ;;  %v1340_v2 = vmov 0.0   ;;  %v250_v3 = vld [vmem:[%s1684_s1 + $0x10] sm:$0xff]  ;;  %vm237_vm0 = vcmask 64512   ;;  %s211_s3 = scalar_select %p210_p11, %s1330_s12, 1  ;;  %v249_v5 = vld [vmem:[%s1684_s1 + $0x8] sm:$0xff] }
  0x15   : > { %v1037_v1 = vld [vmem:[%s1684_s1 + $0x38] sm:$0xff]  ;;  %1115 = vmatprep.subr.mxu0 %v1340_v2  ;;  %1126 = vmatprep.subr.mxu1 %v1340_v2  ;;  %v1036_v4 = vld [vmem:[%s1684_s1 + $0x30] sm:$0xff]  ;;  %238 = vst.msk [vmem:[#allocation2] sm:$0xff] %vm237_vm0, %v1340_v2  ;;  %239 = vst.msk [vmem:[#allocation2 + $0x8] sm:$0xff] %vm237_vm0, %v1340_v2  ;;  %vm252_vm1 = vcmask 261120   ;;  %vm1341_vm2 = vmmov 0  }
  0x16   : > { %1116 = vmatpush3.msra.mxu0 %v251_v0  ;;  %1127 = vmatpush3.msra.mxu1 %v1037_v1  ;;  %240 = vst.msk [vmem:[#allocation2 + $0x10] sm:$0xff] %vm237_vm0, %v1340_v2  ;;  %241 = vst.msk [vmem:[#allocation2 + $0x18] sm:$0xff] %vm237_vm0, %v1340_v2  ;;  %v1035_v6 = vld [vmem:[%s1684_s1 + $0x28] sm:$0xff]  ;;  %s1032_s8 = sshll.u32 %s211_s3, 3  ;;  %v248_v7 = vld [vmem:[%s1684_s1] sm:$0xff]  ;;  %s1268_s3 = scalar_lea.vmem %s1267_s30, 2048 }
  0x17   : > { %242 = vst.msk [vmem:[#allocation2 + $0x20] sm:$0xff] %vm237_vm0, %v1340_v2  ;;  %243 = vst.msk [vmem:[#allocation2 + $0x28] sm:$0xff] %vm237_vm0, %v1340_v2  ;;  %1117 = vmatprep.subr.mxu0 %v1340_v2  ;;  %1128 = vmatprep.subr.mxu1 %v1340_v2  ;;  %s219_s23 = scalar_lea.vmem %s1683_s0, %s1032_s8  ;;  %v1034_v8 = vld [vmem:[%s1684_s1 + $0x20] sm:$0xff]  ;;  %v1042_v10 = vld [vmem:[%s1684_s1 + $0x58] sm:$0xff] }
  0x18   : > { %244 = vst.msk [vmem:[#allocation2 + $0x30] sm:$0xff] %vm237_vm0, %v1340_v2  ;;  %245 = vst.msk [vmem:[#allocation2 + $0x38] sm:$0xff] %vm237_vm0, %v1340_v2  ;;  %1118 = vmatpush3.msra.mxu0 %v250_v3  ;;  %1129 = vmatpush3.msra.mxu1 %v1036_v4  ;;  %v1468_v9 = vld [vmem:[%s219_s23] sm:$0xff]  ;;  %v1047_v11 = vld [vmem:[%s1684_s1 + $0x78] sm:$0xff]  ;;  %s1074_s23 = sshll.u32 %s1330_s12, 10  ;;  %s1262_s12 = scalar_lea.vmem %s1630_s24, 1024 }
  0x19   : > { %1119 = vmatprep.subr.mxu0 %v1340_v2  ;;  %1130 = vmatprep.subr.mxu1 %v1340_v2  ;;  %v1041_v12 = vld [vmem:[%s1684_s1 + $0x50] sm:$0xff]  ;;  %v1040_v14 = vld [vmem:[%s1684_s1 + $0x48] sm:$0xff]  ;;  %v1039_v16 = vld [vmem:[%s1684_s1 + $0x40] sm:$0xff]  ;;  %s1628_s27 = scalar_lea.hbm %s1685_s2, %s1074_s23  ;;  %p1263_p12 = scmp.ne.s32.totalorder %s1630_s24, %s1262_s12 }
  0x1a   : > { %1120 = vmatpush3.msra.mxu0 %v249_v5  ;;  %1131 = vmatpush3.msra.mxu1 %v1035_v6  ;;  %v1046_v13 = vld [vmem:[%s1684_s1 + $0x70] sm:$0xff]  ;;  %v1045_v15 = vld [vmem:[%s1684_s1 + $0x68] sm:$0xff]  ;;  %v1044_v17 = vld [vmem:[%s1684_s1 + $0x60] sm:$0xff]  ;;  %p1270_p2 = scmp.lt.s32.totalorder %s1268_s3, %s1262_s12 }
  0x1b   : > { %1121 = vmatprep.subr.mxu0 %v1340_v2  ;;  %1132 = vmatprep.subr.mxu1 %v1340_v2  ;;  %v1052_v18 = vld [vmem:[%s1684_s1 + $0x98] sm:$0xff]  ;;  %v1051_v20 = vld [vmem:[%s1684_s1 + $0x90] sm:$0xff]  ;;  %v1050_v22 = vld [vmem:[%s1684_s1 + $0x88] sm:$0xff]  ;;  %p1264_p13 = pnand %p1263_p12, %p1400_p4 }
  0x1c   : > { %1122 = vmatpush3.msra.mxu0 %v248_v7  ;;  %1123 = vmatprep.mubr.msk.f32.mxu0 %vm1341_vm2, %v1340_v2  ;;  %v1057_v19 = vld [vmem:[%s1684_s1 + $0xb8] sm:$0xff]  ;;  %v1056_v21 = vld [vmem:[%s1684_s1 + $0xb0] sm:$0xff]  ;;  %v1055_v23 = vld [vmem:[%s1684_s1 + $0xa8] sm:$0xff]  ;;  %p1271_p3 = por %p1270_p2, %p1269_p1 }
  0x1d   : > { %1133 = vmatpush3.msra.mxu1 %v1034_v8  ;;  %1134 = vmatprep.mubr.msk.f32.mxu1 %vm1341_vm2, %v1340_v2  ;;  %v1049_v24 = vld [vmem:[%s1684_s1 + $0x80] sm:$0xff]  ;;  %v1062_v26 = vld [vmem:[%s1684_s1 + $0xd8] sm:$0xff]  ;;  %v1061_v28 = vld [vmem:[%s1684_s1 + $0xd0] sm:$0xff]  ;;  %p1265_p0 = pneg %p1264_p13 }
  0x1e   : > { %1124 = vmatmul.mubr.msk.f32.vlgmr.msra.gmra.mxu0 %vm252_vm1, %v1468_v9  ;;  %1135 = vmatmul.mubr.msk.f32.vlgmr.msra.gmra.mxu1 %vm252_vm1, %v1468_v9  ;;  %v1054_v25 = vld [vmem:[%s1684_s1 + $0xa0] sm:$0xff]  ;;  %v1067_v27 = vld [vmem:[%s1684_s1 + $0xf8] sm:$0xff]  ;;  %v1066_v29 = vld [vmem:[%s1684_s1 + $0xf0] sm:$0xff] }
  0x1f   : > { %1137 = vmatprep.subr.mxu0 %v1340_v2  ;;  %1148 = vmatprep.subr.mxu1 %v1340_v2  ;;  %v1060_v30 = vld [vmem:[%s1684_s1 + $0xc8] sm:$0xff]  ;;  %v1059_v32 = vld [vmem:[%s1684_s1 + $0xc0] sm:$0xff]  ;;  %v409_v42 = vld [vmem:[#allocation2 + $0x10] sm:$0xff]  ;;  %p1272_p5 = pnand %p1271_p3, %p1265_p0 }
  0x20   : > { %1138 = vmatpush3.msra.mxu0 %v1042_v10  ;;  %1149 = vmatpush3.msra.mxu1 %v1047_v11  ;;  %v1065_v31 = vld [vmem:[%s1684_s1 + $0xe8] sm:$0xff]  ;;  %v1064_v33 = vld [vmem:[%s1684_s1 + $0xe0] sm:$0xff]  ;;  %v488_v43 = vld [vmem:[#allocation2 + $0x18] sm:$0xff] }
  0x21   : > { %1139 = vmatprep.subr.mxu0 %v1340_v2  ;;  %1150 = vmatprep.subr.mxu1 %v1340_v2  ;;  %v247_v34 = vld [vmem:[#allocation2] sm:$0xff]  ;;  %v330_v35 = vld [vmem:[#allocation2 + $0x8] sm:$0xff]  ;;  %v725_v62 = vld [vmem:[#allocation2 + $0x30] sm:$0xff] }
  0x22   : > { %1140 = vmatpush3.msra.mxu0 %v1041_v12  ;;  %1151 = vmatpush3.msra.mxu1 %v1046_v13  ;;  %v567_v52 = vld [vmem:[#allocation2 + $0x20] sm:$0xff]  ;;  %v646_v53 = vld [vmem:[#allocation2 + $0x28] sm:$0xff]  ;;  %v804_v63 = vld [vmem:[#allocation2 + $0x38] sm:$0xff] }
  0x23   : > { %1141 = vmatprep.subr.mxu0 %v1340_v2  ;;  %1152 = vmatprep.subr.mxu1 %v1340_v2 }
  0x24   : > { %1142 = vmatpush3.msra.mxu0 %v1040_v14  ;;  %1153 = vmatpush3.msra.mxu1 %v1045_v15 }
  0x25   : > { %1143 = vmatprep.subr.mxu0 %v1340_v2  ;;  %1154 = vmatprep.subr.mxu1 %v1340_v2 }
  0x26   : > { %1144 = vmatpush3.msra.mxu0 %v1039_v16  ;;  %1145 = vmatprep.mubr.msk.f32.mxu0 %vm1341_vm2, %v1340_v2 }
  0x27   : > { %1155 = vmatpush3.msra.mxu1 %v1044_v17  ;;  %1156 = vmatprep.mubr.msk.f32.mxu1 %vm1341_vm2, %v1340_v2 }
  0x28   : > { %1146 = vmatmul.mubr.msk.f32.vlgmr.msra.gmra.mxu0 %vm252_vm1, %v1468_v9  ;;  %1157 = vmatmul.mubr.msk.f32.vlgmr.msra.gmra.mxu1 %vm252_vm1, %v1468_v9 }
  0x29   : > { %1159 = vmatprep.subr.mxu0 %v1340_v2  ;;  %1170 = vmatprep.subr.mxu1 %v1340_v2 }
  0x2a   : > { %1160 = vmatpush3.msra.mxu0 %v1052_v18  ;;  %1171 = vmatpush3.msra.mxu1 %v1057_v19 }
  0x2b   : > { %1161 = vmatprep.subr.mxu0 %v1340_v2  ;;  %1172 = vmatprep.subr.mxu1 %v1340_v2 }
  0x2c   : > { %1162 = vmatpush3.msra.mxu0 %v1051_v20  ;;  %1173 = vmatpush3.msra.mxu1 %v1056_v21 }
  0x2d   : > { %1163 = vmatprep.subr.mxu0 %v1340_v2  ;;  %1174 = vmatprep.subr.mxu1 %v1340_v2 }
  0x2e   : > { %1164 = vmatpush3.msra.mxu0 %v1050_v22  ;;  %1175 = vmatpush3.msra.mxu1 %v1055_v23 }
  0x2f   : > { %1165 = vmatprep.subr.mxu0 %v1340_v2  ;;  %1176 = vmatprep.subr.mxu1 %v1340_v2 }
  0x30   : > { %1166 = vmatpush3.msra.mxu0 %v1049_v24  ;;  %1167 = vmatprep.mubr.msk.f32.mxu0 %vm1341_vm2, %v1340_v2 }
  0x31   : > { %1177 = vmatpush3.msra.mxu1 %v1054_v25  ;;  %1178 = vmatprep.mubr.msk.f32.mxu1 %vm1341_vm2, %v1340_v2 }
  0x32   : > { %1168 = vmatmul.mubr.msk.f32.vlgmr.msra.gmra.mxu0 %vm252_vm1, %v1468_v9  ;;  %1179 = vmatmul.mubr.msk.f32.vlgmr.msra.gmra.mxu1 %vm252_vm1, %v1468_v9 }
  0x33   : > { %1181 = vmatprep.subr.mxu0 %v1340_v2  ;;  %1192 = vmatprep.subr.mxu1 %v1340_v2 }
  0x34   : > { %1182 = vmatpush3.msra.mxu0 %v1062_v26  ;;  %1193 = vmatpush3.msra.mxu1 %v1067_v27 }
  0x35   : > { %1183 = vmatprep.subr.mxu0 %v1340_v2  ;;  %1194 = vmatprep.subr.mxu1 %v1340_v2 }
  0x36   : > { %1184 = vmatpush3.msra.mxu0 %v1061_v28  ;;  %1195 = vmatpush3.msra.mxu1 %v1066_v29 }
  0x37   : > { %1185 = vmatprep.subr.mxu0 %v1340_v2  ;;  %1196 = vmatprep.subr.mxu1 %v1340_v2 }
  0x38   : > { %1186 = vmatpush3.msra.mxu0 %v1060_v30  ;;  %1197 = vmatpush3.msra.mxu1 %v1065_v31 }
  0x39   : > { %1187 = vmatprep.subr.mxu0 %v1340_v2  ;;  %1198 = vmatprep.subr.mxu1 %v1340_v2 }
  0x3a   : > { %1188 = vmatpush3.msra.mxu0 %v1059_v32  ;;  %1189 = vmatprep.mubr.msk.f32.mxu0 %vm1341_vm2, %v1340_v2 }
  0x3b   : > { %1199 = vmatpush3.msra.mxu1 %v1064_v33  ;;  %1200 = vmatprep.mubr.msk.f32.mxu1 %vm1341_vm2, %v1340_v2 }
  0x3c   : > { %1190 = vmatmul.mubr.msk.f32.vlgmr.msra.gmra.mxu0 %vm252_vm1, %v1468_v9  ;;  %1201 = vmatmul.mubr.msk.f32.vlgmr.msra.gmra.mxu1 %vm252_vm1, %v1468_v9 }
  0xde   : > { %v322_v36 = vpop.f32.mrf.mxu0  ;;  %v402_v37 = vpop.f32.mrf.mxu1 }
  0xdf   : > { %v326_v38 = vadd.f32 %v322_v36, %v247_v34  ;;  %v406_v39 = vadd.f32 %v402_v37, %v330_v35 }
  0xe0   : > { %v1125_v40 = vpop.f32.mrf.mxu0  ;;  %v1136_v41 = vpop.f32.mrf.mxu1 }
  0xe1   : > { %328 = vst.msk [vmem:[#allocation2] sm:$0xff] %vm237_vm0, %v326_v38  ;;  %407 = vst.msk [vmem:[#allocation2 + $0x8] sm:$0xff] %vm237_vm0, %v406_v39 }
  0xe8   : > { %v885_v44 = vld [vmem:[#allocation2] sm:$0xff]  ;;  %v886_v45 = vld [vmem:[#allocation2 + $0x8] sm:$0xff]  ;;  %v481_v46 = vpop.f32.mrf.mxu0  ;;  %v560_v47 = vpop.f32.mrf.mxu1 }
  0xe9   : > { %893 = vst.msk [vmem:[%s1603_s20] sm:$0xff] %vm237_vm0, %v885_v44  ;;  %894 = vst.msk [vmem:[%s1603_s20 + $0x8] sm:$0xff] %vm237_vm0, %v886_v45  ;;  %v485_v48 = vadd.f32 %v481_v46, %v409_v42  ;;  %v564_v49 = vadd.f32 %v560_v47, %v488_v43 }
  0xea   : > { %v1147_v50 = vpop.f32.mrf.mxu0  ;;  %v1158_v51 = vpop.f32.mrf.mxu1 }
  0xeb   : > { %486 = vst.msk [vmem:[#allocation2 + $0x10] sm:$0xff] %vm237_vm0, %v485_v48  ;;  %565 = vst.msk [vmem:[#allocation2 + $0x18] sm:$0xff] %vm237_vm0, %v564_v49 }
  0xf2   : > { %v887_v54 = vld [vmem:[#allocation2 + $0x10] sm:$0xff]  ;;  %v888_v55 = vld [vmem:[#allocation2 + $0x18] sm:$0xff]  ;;  %v639_v56 = vpop.f32.mrf.mxu0  ;;  %v718_v57 = vpop.f32.mrf.mxu1 }
  0xf3   : > { %895 = vst.msk [vmem:[%s1603_s20 + $0x10] sm:$0xff] %vm237_vm0, %v887_v54  ;;  %896 = vst.msk [vmem:[%s1603_s20 + $0x18] sm:$0xff] %vm237_vm0, %v888_v55  ;;  %v643_v58 = vadd.f32 %v639_v56, %v567_v52  ;;  %v722_v59 = vadd.f32 %v718_v57, %v646_v53 }
  0xf4   : > { %v1169_v60 = vpop.f32.mrf.mxu0  ;;  %v1180_v61 = vpop.f32.mrf.mxu1 }
  0xf5   : > { %644 = vst.msk [vmem:[#allocation2 + $0x20] sm:$0xff] %vm237_vm0, %v643_v58  ;;  %723 = vst.msk [vmem:[#allocation2 + $0x28] sm:$0xff] %vm237_vm0, %v722_v59 }
  0xfc   : > { %v889_v0 = vld [vmem:[#allocation2 + $0x20] sm:$0xff]  ;;  %v890_v1 = vld [vmem:[#allocation2 + $0x28] sm:$0xff]  ;;  %v797_v2 = vpop.f32.mrf.mxu0  ;;  %v876_v3 = vpop.f32.mrf.mxu1 }
  0xfd   : > { %897 = vst.msk [vmem:[%s1603_s20 + $0x20] sm:$0xff] %vm237_vm0, %v889_v0  ;;  %898 = vst.msk [vmem:[%s1603_s20 + $0x28] sm:$0xff] %vm237_vm0, %v890_v1  ;;  %v801_v4 = vadd.f32 %v797_v2, %v725_v62  ;;  %v880_v5 = vadd.f32 %v876_v3, %v804_v63 }
  0xfe   : > { %v1191_v6 = vpop.f32.mrf.mxu0  ;;  %v1202_v7 = vpop.f32.mrf.mxu1 }
  0xff   : > { %802 = vst.msk [vmem:[#allocation2 + $0x30] sm:$0xff] %vm237_vm0, %v801_v4  ;;  %881 = vst.msk [vmem:[#allocation2 + $0x38] sm:$0xff] %vm237_vm0, %v880_v5 }
 0x106   : > { %v891_v8 = vld [vmem:[#allocation2 + $0x30] sm:$0xff]  ;;  %v892_v9 = vld [vmem:[#allocation2 + $0x38] sm:$0xff] }
 0x107   : > { %899 = vst.msk [vmem:[%s1603_s20 + $0x30] sm:$0xff] %vm237_vm0, %v891_v8  ;;  %900 = vst.msk [vmem:[%s1603_s20 + $0x38] sm:$0xff] %vm237_vm0, %v892_v9 }
 0x108   : > { %1275 = shalt.err (!%p1272_p5)
}
 0x109   : > { %s1276_s4 = scalar_lea.hbm %s1628_s27, 1024  ;;  %s1280_s7 = scalar_lea.hbm %s1685_s2, 2048 }
 0x10a   : > { %p1277_p6 = scmp.ne.s32.totalorder %s1628_s27, %s1276_s4  ;;  %p1281_p10 = scmp.lt.s32.totalorder %s1628_s27, %s1685_s2 }
 0x10b   : > { %p1282_p11 = scmp.lt.s32.totalorder %s1280_s7, %s1276_s4 }
 0x10c   : > { %p1278_p7 = pnand %p1277_p6, %p1400_p4 }
 0x10d   : > { %p1283_p12 = por %p1282_p11, %p1281_p10 }
 0x10e   : > { %p1279_p9 = pneg %p1278_p7 }
 0x110   : > { %p1284_p13 = pnand %p1283_p12, %p1279_p9 }
 0x112   : > { %1287 = shalt.err (!%p1284_p13)
}
 0x113   : > { %s1343_s16 = smov 128   ;;  %s1344_s18 = smov 8  }
 0x114   : > { %1203 = dma.vmem_to_hbm [thread:$0]  (%p1400_p4), %s1630_s24, 1024, %s1628_s27, %s1638_s28, %s1343_s16, %s1343_s16, %s1344_s18  }
 0x115 PF: > { %p1209_p0 = scmp.ge.s32.totalorder %s1338_s14, 2  ;;  %s933_s20 = sand.u32 1, %s1318_s9  }
 0x116   : > { %s934_s23 = scalar_lea.sflag [#allocation4], %s933_s20 }
 0x117   : > { %p1206_p1 = pnand %p1209_p0, %p1407_p8 }
 0x119   : > { %p1207_p2 = pneg %p1206_p1 }
 0x11b   : > { %1313 = dma.done.wait (%p1207_p2), %s934_s23, 1024  }
 0x11c   : > { %1315 = vsyncadd (%p1207_p2), %s934_s23, 4294966272  ;;  %s15_s14 = sadd.s32 1, %s1338_s14   ;;  %s1688_s9 = smov %s1322_s10 }
 0x11d   : > { %p12_p3 = scmp.ge.s32.totalorder %s15_s14, 4   ;;  %s1689_s10 = smov %s1326_s11 }
 0x11e   : > { %s1690_s11 = smov %s1413_s22  ;;  %s1691_s12 = smov %s1334_s13 }
 0x11f   : > { %s1692_s13 = smov %s1694_s17  ;;  %14 = sbr.rel (!%p12_p3) target bundleno = 4 (0x4), region = 88 }
 0x124   :  { %939 = vsyncpa [#allocation4], 1 }
 0x125   :  { %941 = vsyncpa [#allocation4 + $0x1], 1 }

</bundles_post_ra>
